<compile_context>
chip_gen: v6e
topology: v6e:2x2x1
jax: 0.10.0
libtpu: 0.0.40
codegen_flags: <defaults>
</compile_context>

<pallas_src>
import functools
import math

import jax
import jax.numpy as jnp
from jax.experimental import pallas as pl
from jax.experimental.pallas import tpu as pltpu


def _round_up(x, m):
    return (x + m - 1) // m * m


def _pick(dim, preferred):
    """Largest preferred tile dividing `dim`, else the full dim (always legal)."""
    for t in preferred:
        if dim % t == 0:
            return t
    return dim


# -----------------------------------------------------------------------------
# Tiled GEMM + bias:  out = x @ w + b     x:(M,K) bf16   w:(K,N) bf16   b:(1,N) f32
# -----------------------------------------------------------------------------
def _matmul_bias_kernel(x_ref, w_ref, b_ref, o_ref, acc_ref):
    @pl.when(pl.program_id(2) == 0)
    def _init():
        acc_ref[...] = jnp.zeros_like(acc_ref)

    # bf16 operands straight into the MXU; f32 accumulation in VMEM scratch.
    acc_ref[...] += jnp.dot(x_ref[...], w_ref[...], preferred_element_type=jnp.float32)

    @pl.when(pl.program_id(2) == pl.num_programs(2) - 1)
    def _finalize():
        o_ref[...] = (acc_ref[...] + b_ref[...]).astype(o_ref.dtype)


def _matmul_bias(x, w, b, out_dtype):
    M, K = x.shape
    K2, N = w.shape
    assert K == K2

    # Row tiling: prefer big tiles; pad M for large non-divisible row counts so we
    # never fall back to one giant block (perf cliff flagged in the review).
    tm = _pick(M, (512, 256, 128))
    Mp = M
    if tm == M and M > 512:
        Mp = _round_up(M, 128)
        x = jnp.pad(x, ((0, Mp - M), (0, 0)))
        tm = _pick(Mp, (512, 256, 128))
    tn = _pick(N, (1024, 512, 256, 128))
    tk = _pick(K, (512, 256, 128))

    grid = (Mp // tm, N // tn, K // tk)
    out_isz = jnp.dtype(out_dtype).itemsize
    cost = pl.CostEstimate(
        flops=2 * Mp * N * K,
        transcendentals=0,
        bytes_accessed=int(
            x.dtype.itemsize * Mp * K * (N // tn)      # x re-streamed per N tile
            + w.dtype.itemsize * K * N * (Mp // tm)    # w re-streamed per M tile
            + 4 * N + out_isz * Mp * N),
    )

    out = pl.pallas_call(
        _matmul_bias_kernel,
        out_shape=jax.ShapeDtypeStruct((Mp, N), out_dtype),
        grid_spec=pltpu.PrefetchScalarGridSpec(
            num_scalar_prefetch=0,
            grid=grid,
            in_specs=[
                pl.BlockSpec((tm, tk), lambda i, j, k: (i, k)),   # x tile (bf16)
                pl.BlockSpec((tk, tn), lambda i, j, k: (k, j)),   # w tile (bf16, pre-transposed)
                pl.BlockSpec((1, tn), lambda i, j, k: (0, j)),    # bias tile (f32)
            ],
            out_specs=pl.BlockSpec((tm, tn), lambda i, j, k: (i, j)),
            scratch_shapes=[pltpu.VMEM((tm, tn), jnp.float32)],
        ),
        compiler_params=pltpu.CompilerParams(
            dimension_semantics=("parallel", "parallel", "arbitrary"),
            vmem_limit_bytes=40 * 1024 * 1024,   # sized for v7x (64 MiB/TC) headroom
        ),
        cost_estimate=cost,
    )(x, w, b)
    return out[:M] if Mp != M else out


# -----------------------------------------------------------------------------
# Flash-style multi-head attention core.
#   q : (B, H, S, hd) bf16   k : (B, H, hd, S) bf16 (pre-transposed)   v : (B, H, S, hd) bf16
#   out : (B, S, D) bf16, heads already merged (lane-dense).
# -----------------------------------------------------------------------------
def _flash_attn_kernel(q_ref, k_ref, v_ref, o_ref, m_sc, l_sc, acc_sc, *,
                       num_heads, kv_tile, seq_len, needs_mask):
    kv = pl.program_id(2)

    @pl.when(kv == 0)
    def _init():
        m_sc[...] = jnp.full_like(m_sc, -jnp.inf)
        l_sc[...] = jnp.zeros_like(l_sc)
        acc_sc[...] = jnp.zeros_like(acc_sc)

    q = q_ref[0]                      # (H, tq, hd) bf16 — 1/sqrt(hd) folded into W_q
    k = k_ref[0]                      # (H, hd, tk) bf16 — pre-transposed, no in-loop XLU
    v = v_ref[0]                      # (H, tk, hd) bf16

    # bf16 operands, f32 accumulation (native MXU rate on all generations).
    s = jnp.einsum("hqd,hdk->hqk", q, k, preferred_element_type=jnp.float32)  # (H, tq, tk)

    if needs_mask:  # only traced when the sequence was padded to a tile multiple
        kpos = kv * kv_tile + jax.lax.broadcasted_iota(jnp.int32, (1, 1, kv_tile), 2)
        s = jnp.where(kpos < seq_len, s, -jnp.inf)

    m_prev = m_sc[...]
    m_new = jnp.maximum(m_prev, s.max(axis=-1, keepdims=True))
    alpha = jnp.exp(m_prev - m_new)
    p = jnp.exp(s - m_new)                                   # f32 (v5e-safe)
    l_sc[...] = alpha * l_sc[...] + p.sum(axis=-1, keepdims=True)
    acc_sc[...] = alpha * acc_sc[...] + jnp.einsum(
        "hqk,hkd->hqd", p.astype(v.dtype), v, preferred_element_type=jnp.float32)
    m_sc[...] = m_new

    @pl.when(kv == pl.num_programs(2) - 1)
    def _finalize():
        l = l_sc[...]
        inv = pl.reciprocal(l, approx=True)      # EUP slot
        inv = inv * (2.0 - l * inv)              # one Newton step -> ~exact 1/l
        out = acc_sc[...] * inv                  # (H, tq, hd) f32
        # In-kernel head merge -> lane-dense (tq, H*hd = D) unmasked store, once per q-tile.
        merged = jnp.concatenate([out[h] for h in range(num_heads)], axis=-1)
        o_ref[0] = merged.astype(o_ref.dtype)


def _attn_tiles(seq, num_heads):
    """Pick (tq, tk) so the f32 score + bf16 prob intermediates stay v7x-friendly."""
    tq = _pick(seq, (256, 128))
    tk = _pick(seq, (512, 256, 128))
    budget = 12 * 1024 * 1024       # bytes for H*tq*tk*(4 + 2) intermediates
    while num_heads * tq * tk * 6 > budget and tk >= 256:
        tk //= 2
    while num_heads * tq * tk * 6 > budget and tq >= 256:
        tq //= 2
    return tq, tk


def _flash_attention(q, k, v, *, seq_len):
    B, H, Sp, hd = q.shape
    D = H * hd
    tq, tk = _attn_tiles(Sp, H)
    grid = (B, Sp // tq, Sp // tk)
    needs_mask = Sp != seq_len
    nq = Sp // tq
    cost = pl.CostEstimate(
        flops=4 * B * H * Sp * Sp * hd,
        transcendentals=B * H * Sp * Sp,
        bytes_accessed=int(q.dtype.itemsize * B * H * Sp * hd * (1 + 2 * nq)  # K/V re-streamed
                           + 2 * B * Sp * D),
    )
    kernel = functools.partial(_flash_attn_kernel, num_heads=H, kv_tile=tk,
                               seq_len=seq_len, needs_mask=needs_mask)
    return pl.pallas_call(
        kernel,
        out_shape=jax.ShapeDtypeStruct((B, Sp, D), jnp.bfloat16),
        grid_spec=pltpu.PrefetchScalarGridSpec(
            num_scalar_prefetch=0,
            grid=grid,
            in_specs=[
                pl.BlockSpec((1, H, tq, hd), lambda b, qi, ki: (b, 0, qi, 0)),
                pl.BlockSpec((1, H, hd, tk), lambda b, qi, ki: (b, 0, 0, ki)),
                pl.BlockSpec((1, H, tk, hd), lambda b, qi, ki: (b, 0, ki, 0)),
            ],
            out_specs=pl.BlockSpec((1, tq, D), lambda b, qi, ki: (b, qi, 0)),
            scratch_shapes=[
                pltpu.VMEM((H, tq, 1), jnp.float32),    # running max
                pltpu.VMEM((H, tq, 1), jnp.float32),    # running denom
                pltpu.VMEM((H, tq, hd), jnp.float32),   # output accumulator
            ],
        ),
        compiler_params=pltpu.CompilerParams(
            dimension_semantics=("parallel", "parallel", "arbitrary"),
            vmem_limit_bytes=40 * 1024 * 1024,   # sized for v7x (64 MiB/TC)
        ),
        cost_estimate=cost,
    )(q, k, v)


# -----------------------------------------------------------------------------
# Full SelfAttentionBlock forward (same semantics as the torch module).
# -----------------------------------------------------------------------------
def self_attention_block(x, w_in, b_in, w_out, b_out, *, num_heads):
    """x: (B, S, D).  Weights in torch nn.MultiheadAttention layout:
       w_in (3D, D), b_in (3D,), w_out (D, D), b_out (D,).  Returns (B, S, D) f32."""
    B, S, D = x.shape
    assert D % num_heads == 0
    hd = D // num_heads
    scale = 1.0 / math.sqrt(hd)

    # Host-side weight prep (one-time): fold the softmax scale into the Q rows,
    # pre-transpose so kernels consume lane-dense RHS operands, cast to bf16 for
    # the MXU.  Biases stay f32 (added to the f32 accumulator at finalize).
    w_in_scaled = jnp.concatenate([w_in[:D] * scale, w_in[D:]], axis=0)
    w_in_t = jnp.transpose(w_in_scaled).astype(jnp.bfloat16)            # (D, 3D)
    b_in_f = jnp.concatenate([b_in[:D] * scale, b_in[D:]]).reshape(1, 3 * D).astype(jnp.float32)
    w_out_t = jnp.transpose(w_out).astype(jnp.bfloat16)                 # (D, D)
    b_out_f = b_out.reshape(1, D).astype(jnp.float32)

    # Pad the sequence only when it is large and does not tile by 128 (keeps the
    # flash kernel from materializing a full SxS score block on awkward shapes).
    Sp = S
    if S % 128 != 0 and S > 256:
        Sp = _round_up(S, 128)
    xp = x if Sp == S else jnp.pad(x, ((0, 0), (0, Sp - S), (0, 0)))

    # 1) fused QKV in-projection: one GEMM over all B*Sp rows, bf16 operands, f32 accum.
    qkv = _matmul_bias(xp.reshape(B * Sp, D).astype(jnp.bfloat16), w_in_t, b_in_f,
                       out_dtype=jnp.bfloat16)                          # (B*Sp, 3D)

    # Head split (layout plumbing in the wrapper); emit K already transposed per head.
    qkv = qkv.reshape(B, Sp, 3, num_heads, hd)
    q = qkv[:, :, 0].transpose(0, 2, 1, 3)    # (B, H, Sp, hd)
    k = qkv[:, :, 1].transpose(0, 2, 3, 1)    # (B, H, hd, Sp)  pre-transposed for the MXU
    v = qkv[:, :, 2].transpose(0, 2, 1, 3)    # (B, H, Sp, hd)

    # 2) flash attention; output is already head-merged and lane-dense: (B, Sp, D) bf16.
    attn = _flash_attention(q, k, v, seq_len=S)

    # 3) out-projection straight from the merged layout (no wrapper transpose).
    out = _matmul_bias(attn.reshape(B * Sp, D), w_out_t, b_out_f, out_dtype=jnp.float32)
    out = out.reshape(B, Sp, D)
    return out if Sp == S else out[:, :S, :]


# -----------------------------------------------------------------------------
# Pure-JAX reference replicating nn.MultiheadAttention forward (no masks/dropout).
# -----------------------------------------------------------------------------
def _reference_mha(x, w_in, b_in, w_out, b_out, num_heads):
    B, S, D = x.shape
    hd = D // num_heads
    qkv = jnp.einsum('bsd,ed->bse', x, w_in) + b_in        # (B, S, 3D)
    q, k, v = qkv[..., :D], qkv[..., D:2 * D], qkv[..., 2 * D:]
    q = q.reshape(B, S, num_heads, hd).transpose(0, 2, 1, 3) / math.sqrt(hd)
    k = k.reshape(B, S, num_heads, hd).transpose(0, 2, 1, 3)
    v = v.reshape(B, S, num_heads, hd).transpose(0, 2, 1, 3)
    scores = jnp.einsum('bhqd,bhkd->bhqk', q, k)
    probs = jax.nn.softmax(scores, axis=-1)
    attn = jnp.einsum('bhqk,bhkd->bhqd', probs, v)
    attn = attn.transpose(0, 2, 1, 3).reshape(B, S, D)
    return jnp.einsum('bsd,ed->bse', attn, w_out) + b_out


if __name__ == "__main__":
    B, S, D, H = 2, 8, 32, 4

    key = jax.random.PRNGKey(0)
    kx, kw1, kb1, kw2, kb2 = jax.random.split(key, 5)

    x = jax.random.normal(kx, (B, S, D), dtype=jnp.float32)
    # Shapes from nn.MultiheadAttention(D, H):
    #   in_proj_weight (3D, D), in_proj_bias (3D,), out_proj.weight (D, D), out_proj.bias (D,)
    w_in = jax.random.normal(kw1, (3 * D, D), dtype=jnp.float32) * (1.0 / math.sqrt(D))
    b_in = jax.random.normal(kb1, (3 * D,), dtype=jnp.float32) * 0.02
    w_out = jax.random.normal(kw2, (D, D), dtype=jnp.float32) * (1.0 / math.sqrt(D))
    b_out = jax.random.normal(kb2, (D,), dtype=jnp.float32) * 0.02

    out = self_attention_block(x, w_in, b_in, w_out, b_out, num_heads=H)
    out = jax.block_until_ready(out)

    ref = _reference_mha(x, w_in, b_in, w_out, b_out, H)
    # bf16 MXU operands (f32 accumulation) bound the achievable precision against an
    # all-f32 reference; a broken kernel would be orders of magnitude outside these.
    max_err = float(jnp.max(jnp.abs(out - ref)))
    rel_err = float(jnp.linalg.norm(out - ref) / (jnp.linalg.norm(ref) + 1e-12))
    assert max_err < 1e-1 and rel_err < 3e-2, f"mismatch: max={max_err} rel={rel_err}"

    print("KERNEL_OK")
</pallas_src>

<mosaic_0001>
module attributes {stable_mosaic.version = 11 : i64} {
  func.func @_matmul_bias_kernel(%arg0: i32, %arg1: i32, %arg2: i32, %arg3: memref<16x32xbf16, #tpu.memory_space<vmem>>, %arg4: memref<32x96xbf16, #tpu.memory_space<vmem>>, %arg5: memref<1x96xf32, #tpu.memory_space<vmem>>, %arg6: memref<16x96xbf16, #tpu.memory_space<vmem>>, %arg7: memref<16x96xf32, #tpu.memory_space<vmem>>) attributes {dimension_semantics = [#tpu.dimension_semantics<parallel>, #tpu.dimension_semantics<parallel>, #tpu.dimension_semantics<arbitrary>], iteration_bounds = array<i64: 1, 1, 1>, scalar_prefetch = 0 : i64, scratch_operands = 1 : i64, tpu.core_type = #tpu.core_type<tc>, window_params = [{transform_indices = @transform_0, window_bounds = array<i64: 16, 32>}, {transform_indices = @transform_1, window_bounds = array<i64: 32, 96>}, {transform_indices = @transform_2, window_bounds = array<i64: 1, 96>}, {transform_indices = @transform_3, window_bounds = array<i64: 16, 96>}]} {
    %c0_i32 = arith.constant 0 : i32
    %0 = arith.cmpi eq, %arg2, %c0_i32 : i32
    %1 = arith.extui %0 : i1 to i32
    %c0_i32_0 = arith.constant 0 : i32
    %2 = arith.cmpi ne, %1, %c0_i32_0 : i32
    scf.if %2 {
      %cst_10 = arith.constant 0.000000e+00 : f32
      %12 = vector.broadcast %cst_10 : f32 to vector<16x96xf32>
      %c0_11 = arith.constant 0 : index
      %c0_12 = arith.constant 0 : index
      %13 = vector.load %arg7[%c0_11, %c0_12] : memref<16x96xf32, #tpu.memory_space<vmem>>, vector<16x96xf32>
      tpu.vector_store %arg7[%c0_11, %c0_12], %12 {strides = array<i32>} : memref<16x96xf32, #tpu.memory_space<vmem>>, vector<16x96xf32>,
    } else {
    }
    %c0 = arith.constant 0 : index
    %c0_1 = arith.constant 0 : index
    %3 = vector.load %arg7[%c0, %c0_1] : memref<16x96xf32, #tpu.memory_space<vmem>>, vector<16x96xf32>
    %c0_2 = arith.constant 0 : index
    %c0_3 = arith.constant 0 : index
    %4 = vector.load %arg3[%c0_2, %c0_3] : memref<16x32xbf16, #tpu.memory_space<vmem>>, vector<16x32xbf16>
    %c0_4 = arith.constant 0 : index
    %c0_5 = arith.constant 0 : index
    %5 = vector.load %arg4[%c0_4, %c0_5] : memref<32x96xbf16, #tpu.memory_space<vmem>>, vector<32x96xbf16>
    %cst = arith.constant dense<0.000000e+00> : vector<16x96xf32>
    %6 = tpu.matmul %4, %5, %cst {dimension_numbers = #tpu.dot_dimension_numbers<[1], [0], [0], [1], [0, 0, 1, 1], [], []>} : vector<16x32xbf16>, vector<32x96xbf16>, vector<16x96xf32> -> vector<16x96xf32>
    %7 = arith.addf %3, %6 : vector<16x96xf32>
    %c0_6 = arith.constant 0 : index
    %c0_7 = arith.constant 0 : index
    %8 = vector.load %arg7[%c0_6, %c0_7] : memref<16x96xf32, #tpu.memory_space<vmem>>, vector<16x96xf32>
    tpu.vector_store %arg7[%c0_6, %c0_7], %7 {strides = array<i32>} : memref<16x96xf32, #tpu.memory_space<vmem>>, vector<16x96xf32>,
    %c0_i32_8 = arith.constant 0 : i32
    %9 = arith.cmpi eq, %arg2, %c0_i32_8 : i32
    %10 = arith.extui %9 : i1 to i32
    %c0_i32_9 = arith.constant 0 : i32
    %11 = arith.cmpi ne, %10, %c0_i32_9 : i32
    scf.if %11 {
      %c0_10 = arith.constant 0 : index
      %c0_11 = arith.constant 0 : index
      %12 = vector.load %arg7[%c0_10, %c0_11] : memref<16x96xf32, #tpu.memory_space<vmem>>, vector<16x96xf32>
      %c0_12 = arith.constant 0 : index
      %c0_13 = arith.constant 0 : index
      %13 = vector.load %arg5[%c0_12, %c0_13] : memref<1x96xf32, #tpu.memory_space<vmem>>, vector<1x96xf32>
      %14 = vector.broadcast %13 : vector<1x96xf32> to vector<16x96xf32>
      %15 = arith.addf %12, %14 : vector<16x96xf32>
      %16 = arith.truncf %15 : vector<16x96xf32> to vector<16x96xbf16>
      %c0_14 = arith.constant 0 : index
      %c0_15 = arith.constant 0 : index
      %17 = vector.load %arg6[%c0_14, %c0_15] : memref<16x96xbf16, #tpu.memory_space<vmem>>, vector<16x96xbf16>
      tpu.vector_store %arg6[%c0_14, %c0_15], %16 {strides = array<i32>} : memref<16x96xbf16, #tpu.memory_space<vmem>>, vector<16x96xbf16>,
    } else {
    }
    return
  }
  func.func @transform_0(%arg0: i32, %arg1: i32, %arg2: i32) -> (i32, i32) {
    %c0_i32 = arith.constant 0 : i32
    return %arg0, %arg2 : i32, i32
  }
  func.func @transform_1(%arg0: i32, %arg1: i32, %arg2: i32) -> (i32, i32) {
    %c0_i32 = arith.constant 0 : i32
    return %arg2, %arg1 : i32, i32
  }
  func.func @transform_2(%arg0: i32, %arg1: i32, %arg2: i32) -> (i32, i32) {
    %c0_i32 = arith.constant 0 : i32
    %c0_i32_0 = arith.constant 0 : i32
    return %c0_i32, %arg1 : i32, i32
  }
  func.func @transform_3(%arg0: i32, %arg1: i32, %arg2: i32) -> (i32, i32) {
    %c0_i32 = arith.constant 0 : i32
    return %arg0, %arg1 : i32, i32
  }
}

</mosaic_0001>

<bundles_post_ra>
// kernel: tpu_custom_call.1
= control target key start
LH: loop header
LB: loop body
LE: loop exit
PB: predicated region body
PF: predicated region fallthrough
CT: control target
= control target key end

     0   :  { %8 = vsyncpa [#allocation4], 0  ;;  %s317_s0 = inlined_call_operand.hbm [shape: bf16[16,32], index: 0, kind: input, shape index: {}]   ;;  %s318_s1 = inlined_call_operand.hbm [shape: bf16[32,96], index: 1, kind: input, shape index: {}]   ;;  %s319_s2 = inlined_call_operand.vmem [shape: f32[1,96], index: 2, kind: input, shape index: {}]   ;;  %s320_s3 = inlined_call_operand.hbm [shape: bf16[16,96], index: 3, kind: output, shape index: {}]  }
   0x1   :  { %9 = vsyncpa [#allocation7], 0 }
   0x2   :  { %10 = vsyncpa [#allocation5], 0  ;;  %s265_s12 = smov [#allocation3]  }
   0x3   :  { %s16_s13 = sshll.u32 %s265_s12, 4  ;;  %s17_s13 = int_to_ptr.vmem [resolvable:$true] %s16_s13 }
   0x4   :  { %s207_s14 = scalar_lea.vmem %s17_s13, 128  ;;  %p212_p1 = scmp.lt.s32.totalorder %s17_s13, %s17_s13 }
   0x5   :  { %p208_p0 = scmp.ne.s32.totalorder %s17_s13, %s207_s14  ;;  %p213_p2 = scmp.lt.s32.totalorder %s207_s14, %s207_s14 }
   0x7   :  { %p214_p3 = por %p213_p2, %p212_p1 }
   0x9   :  { %p215_p4 = pnand %p214_p3, %p208_p0 }
   0xb   :  { %218 = shalt.err (!%p215_p4)
}
   0xc   :  { %s266_s15 = smov 64   ;;  %s267_s16 = smov 4  }
   0xd   :  { %22 = dma.hbm_to_vmem [thread:$0]  %s317_s0, 128, %s17_s13, [#allocation4], %s266_s15, %s266_s15, %s267_s16  }
   0xe   :  { %s268_s19 = smov [#allocation6]  }
   0xf   :  { %s28_s20 = sshll.u32 %s268_s19, 4  ;;  %s29_s20 = int_to_ptr.vmem [resolvable:$true] %s28_s20 }
  0x10   :  { %s227_s21 = scalar_lea.vmem %s29_s20, 256  ;;  %p232_p6 = scmp.lt.s32.totalorder %s29_s20, %s29_s20 }
  0x11   :  { %p228_p5 = scmp.ne.s32.totalorder %s29_s20, %s227_s21  ;;  %p233_p7 = scmp.lt.s32.totalorder %s227_s21, %s227_s21 }
  0x13   :  { %p234_p8 = por %p233_p7, %p232_p6 }
  0x15   :  { %p235_p9 = pnand %p234_p8, %p228_p5 }
  0x17   :  { %238 = shalt.err (!%p235_p9)
}
  0x18   :  { %34 = dma.hbm_to_vmem [thread:$0]  %s318_s1, 256, %s29_s20, [#allocation7], %s266_s15, %s266_s15, %s267_s16  }
  0x19   :  { %259 = dma.done.wait [#allocation4], 128  }
  0x1a   :  { %260 = vsyncadd [#allocation4], 4294967168 }
  0x1b   :  { %261 = dma.done.wait [#allocation7], 256  }
  0x1c   :  { %262 = vsyncadd [#allocation7], 4294967040  ;;  %vm48_vm0 = vcmask 785408   ;;  %v269_v0 = vmov 0.0   ;;  %vm270_vm1 = vmmov 0   ;;  %v196_v1 = vld [vmem:[#allocation6 + $0x8] sm:$0xff]  }
  0x1d   :  { %49 = vst.msk [vmem:[#allocation2] sm:$0xff] %vm48_vm0, %v269_v0  ;;  %50 = vst.msk [vmem:[#allocation2 + $0x8] sm:$0xff] %vm48_vm0, %v269_v0  ;;  %181 = vmatprep.subr.bf16.mxu0 %v269_v0  ;;  %185 = vmatprep.mubr.msk.bf16.mxu0 %vm270_vm1, %v269_v0  ;;  %v197_v2 = vld [vmem:[#allocation6] sm:$0xff]   ;;  %v198_v3 = vld [vmem:[#allocation3] sm:$0xff]   ;;  %vm76_vm2 = vcmask 261120   ;;  %vm148_vm3 = vcmask 781312  }
  0x1e   :  { %182 = vmatpush3.bf16.msra.mxu0 %v196_v1  ;;  %v173_v12 = vld [vmem:[%s319_s2] ss:$0 sm:$0xff]  ;;  %s271_s24 = smov [#allocation8]  }
  0x1f   :  { %183 = vmatprep.subr.bf16.mxu0 %v269_v0  ;;  %s156_s25 = sshll.u32 %s271_s24, 4  ;;  %s157_s25 = int_to_ptr.vmem [resolvable:$true] %s156_s25 }
  0x20   :  { %s239_s26 = scalar_lea.vmem %s157_s25, 128  ;;  %p244_p11 = scmp.lt.s32.totalorder %s157_s25, %s157_s25 }
  0x21   :  { %p240_p10 = scmp.ne.s32.totalorder %s157_s25, %s239_s26  ;;  %p245_p12 = scmp.lt.s32.totalorder %s239_s26, %s239_s26 }
  0x22   :  { %184 = vmatpush3.bf16.msra.mxu0 %v197_v2 }
  0x23   :  { %p246_p13 = por %p245_p12, %p244_p11 }
  0x24   :  { %v51_v4 = vld [vmem:[#allocation2] sm:$0xff]  ;;  %v52_v8 = vld [vmem:[#allocation2 + $0x8] sm:$0xff] }
  0x25   :  { %186 = vmatmul.mubr.msk.bf16.vlgmr.msra.gmra.mxu0 %vm76_vm2, %v198_v3  ;;  %p247_p0 = pnand %p246_p13, %p240_p10 }
  0xe5   :  { %v114_v5 = vpop.f32.mrf.mxu0 }
  0xe6   :  { %v121_v6 = vadd.f32 %v114_v5, %v51_v4 }
  0xe7   :  { %v187_v7 = vpop.f32.mrf.mxu0 }
  0xe8   :  { %124 = vst.msk [vmem:[#allocation2] sm:$0xff] %vm48_vm0, %v121_v6 }
  0xe9   :  { %v117_v9 = vpop.f32.mrf.mxu0 }
  0xea   :  { %v122_v10 = vadd.f32 %v117_v9, %v52_v8 }
  0xeb   :  { %v188_v11 = vpop.f32.mrf.mxu0 }
  0xec   :  { %125 = vst.msk [vmem:[#allocation2 + $0x8] sm:$0xff] %vm48_vm0, %v122_v10 }
  0xef   :  { %v129_v13 = vld [vmem:[#allocation2] sm:$0xff] }
  0xf0   :  { %v138_v14 = vadd.f32 %v173_v12, %v129_v13 }
  0xf2   :  { %v176_v15 = vpack.c.bf16 %v138_v14, %v138_v14 }
  0xf3   :  { %v130_v16 = vld [vmem:[#allocation2 + $0x8] sm:$0xff] }
  0xf4   :  { %v139_v17 = vadd.f32 %v173_v12, %v130_v16  ;;  %149 = vst.msk [vmem:[#allocation8] sm:$0xf] %vm148_vm3, %v176_v15 }
  0xf6   :  { %v177_v18 = vpack.c.bf16 %v139_v17, %v139_v17 }
  0xf8   :  { %150 = vst.msk [vmem:[#allocation8 + $0x4] sm:$0xf] %vm148_vm3, %v177_v18 }
  0xf9   :  { %250 = shalt.err (!%p247_p0)
}
  0xfa   :  { %162 = dma.vmem_to_hbm [thread:$0]  %s157_s25, 128, %s320_s3, [#allocation5], %s266_s15, %s266_s15, %s267_s16  }
  0xfb   :  { %263 = dma.done.wait [#allocation5], 128  }
  0xfc   :  { %264 = vsyncadd [#allocation5], 4294967168 }
  0xfd   :  { %166 = vsyncpa [#allocation4], 1 }
  0xfe   :  { %167 = vsyncpa [#allocation7], 1 }
  0xff   :  { %168 = vsyncpa [#allocation5], 1 }

</bundles_post_ra>
